<compile_context>
chip_gen: v6e
topology: v6e:2x2x1
jax: 0.10.0
libtpu: 0.0.40
codegen_flags: <defaults>
</compile_context>

<pallas_src>
import jax
import jax.numpy as jnp
from jax.experimental import pallas as pl
from jax.experimental.pallas import tpu as pltpu


def _round_up(x, m):
    return ((x + m - 1) // m) * m


# ---------------------------------------------------------------------------
# Kernel 1: tiled feature transform  H = X @ W   (bf16 in, f32 accum, bf16 out)
# ---------------------------------------------------------------------------
def _xw_kernel(x_ref, w_ref, h_ref, acc_ref):
    @pl.when(pl.program_id(2) == 0)
    def _():
        acc_ref[...] = jnp.zeros_like(acc_ref)

    acc_ref[...] += jnp.dot(x_ref[...], w_ref[...],
                            preferred_element_type=jnp.float32)

    @pl.when(pl.program_id(2) == pl.num_programs(2) - 1)
    def _():
        h_ref[...] = acc_ref[...].astype(h_ref.dtype)


def _feature_transform(x_p, w_p, tm, tn, tk):
    m, k = x_p.shape
    n = w_p.shape[1]
    grid = (m // tm, n // tn, k // tk)
    return pl.pallas_call(
        _xw_kernel,
        out_shape=jax.ShapeDtypeStruct((m, n), jnp.bfloat16),
        grid_spec=pltpu.PrefetchScalarGridSpec(
            num_scalar_prefetch=0,
            grid=grid,
            in_specs=[
                pl.BlockSpec((tm, tk), lambda i, j, l: (i, l)),
                pl.BlockSpec((tk, tn), lambda i, j, l: (l, j)),
            ],
            out_specs=pl.BlockSpec((tm, tn), lambda i, j, l: (i, j)),
            scratch_shapes=[pltpu.VMEM((tm, tn), jnp.float32)],
        ),
        compiler_params=pltpu.CompilerParams(
            dimension_semantics=("parallel", "parallel", "arbitrary"),
            vmem_limit_bytes=32 * 1024 * 1024),
        cost_estimate=pl.CostEstimate(
            flops=2 * m * n * k,
            transcendentals=0,
            bytes_accessed=(m * k + k * n) * 2 + m * n * 2),
    )(x_p, w_p)


# ---------------------------------------------------------------------------
# Kernel 2: tiled aggregation + epilogue   out = relu(A_hat @ H + b)
# ---------------------------------------------------------------------------
def _agg_bias_relu_kernel(a_ref, h_ref, b_ref, o_ref, acc_ref):
    @pl.when(pl.program_id(2) == 0)
    def _():
        acc_ref[...] = jnp.zeros_like(acc_ref)

    acc_ref[...] += jnp.dot(a_ref[...], h_ref[...],
                            preferred_element_type=jnp.float32)

    @pl.when(pl.program_id(2) == pl.num_programs(2) - 1)
    def _():
        o_ref[...] = jnp.maximum(acc_ref[...] + b_ref[...], 0.0
                                 ).astype(o_ref.dtype)


def _aggregate_bias_relu(a_p, h_p, b_p, tm, tn, tk):
    m, k = a_p.shape
    n = h_p.shape[1]
    grid = (m // tm, n // tn, k // tk)
    return pl.pallas_call(
        _agg_bias_relu_kernel,
        out_shape=jax.ShapeDtypeStruct((m, n), jnp.float32),
        grid_spec=pltpu.PrefetchScalarGridSpec(
            num_scalar_prefetch=0,
            grid=grid,
            in_specs=[
                pl.BlockSpec((tm, tk), lambda i, j, l: (i, l)),
                pl.BlockSpec((tk, tn), lambda i, j, l: (l, j)),
                pl.BlockSpec((1, tn), lambda i, j, l: (0, j)),
            ],
            out_specs=pl.BlockSpec((tm, tn), lambda i, j, l: (i, j)),
            scratch_shapes=[pltpu.VMEM((tm, tn), jnp.float32)],
        ),
        compiler_params=pltpu.CompilerParams(
            dimension_semantics=("parallel", "parallel", "arbitrary"),
            vmem_limit_bytes=32 * 1024 * 1024),
        cost_estimate=pl.CostEstimate(
            flops=2 * m * n * k,
            transcendentals=0,
            bytes_accessed=(m * k + k * n) * 2 + n * 4 + m * n * 4),
    )(a_p, h_p, b_p)


# ---------------------------------------------------------------------------
# Wrapper: padding / bf16 cast glue around the two tiled kernels
# ---------------------------------------------------------------------------
def gcn_conv_relu(a_hat, x, w, b):
    """out = relu(a_hat @ (x @ w) + b); a_hat/x/w/b float32, result float32."""
    n, f_in = x.shape
    f_out = w.shape[1]

    # Tile sizes: lane-dense (multiples of 128), capped at 512 so the
    # double-buffered working set fits every generation's scoped VMEM.
    t_n = min(512, _round_up(n, 128))        # node axis (rows & contraction)
    t_fi = min(512, _round_up(f_in, 128))    # input-feature contraction
    t_fo = min(512, _round_up(f_out, 128))   # lane-dense output tile

    n_pad = _round_up(n, t_n)
    fi_pad = _round_up(f_in, t_fi)
    fo_pad = _round_up(f_out, t_fo)

    # Zero-pad and cast MXU inputs to bf16 (accumulation stays f32).
    a_p = jnp.zeros((n_pad, n_pad), jnp.bfloat16
                    ).at[:n, :n].set(a_hat.astype(jnp.bfloat16))
    x_p = jnp.zeros((n_pad, fi_pad), jnp.bfloat16
                    ).at[:n, :f_in].set(x.astype(jnp.bfloat16))
    w_p = jnp.zeros((fi_pad, fo_pad), jnp.bfloat16
                    ).at[:f_in, :f_out].set(w.astype(jnp.bfloat16))
    b_p = jnp.zeros((1, fo_pad), jnp.float32).at[:, :f_out].set(b)

    h_p = _feature_transform(x_p, w_p, t_n, t_fo, t_fi)          # (n_pad, fo_pad) bf16
    out_p = _aggregate_bias_relu(a_p, h_p, b_p, t_n, t_fo, t_n)  # (n_pad, fo_pad) f32
    return out_p[:n, :f_out]


def build_normalized_adjacency(edge_index, num_nodes):
    """Dense A_hat = D^{-1/2} (A + I) D^{-1/2} from edge_index [2, E] (glue)."""
    src, dst = edge_index[0], edge_index[1]
    a = jnp.zeros((num_nodes, num_nodes), jnp.float32)
    # A[dst, src] = 1  => row i aggregates messages from its in-neighbors j.
    a = a.at[dst, src].add(1.0)
    # add self loops
    a = a + jnp.eye(num_nodes, dtype=jnp.float32)
    deg = a.sum(axis=1)  # in-degree incl. self-loop (matches PyG gcn_norm)
    dinv = jnp.where(deg > 0, jax.lax.rsqrt(deg), 0.0)
    return dinv[:, None] * a * dinv[None, :]


class BaseConvLayerPallas:
    """JAX/Pallas mirror of BaseConvLayer(dim_in, dim_out, dropout, 'gcnconv')."""

    def __init__(self, dim_in, dim_out, dropout, key):
        self.dim_in = dim_in
        self.dim_out = dim_out
        self.dropout = dropout
        # Deterministic Glorot-uniform weight (as in PyG GCNConv), zero bias.
        limit = (6.0 / (dim_in + dim_out)) ** 0.5
        self.weight = jax.random.uniform(
            key, (dim_in, dim_out), jnp.float32, minval=-limit, maxval=limit)
        self.bias = jnp.zeros((1, dim_out), jnp.float32)

    def __call__(self, x, edge_index):
        n = x.shape[0]
        a_hat = build_normalized_adjacency(edge_index, n)
        out = gcn_conv_relu(a_hat, x, self.weight, self.bias)
        # eval-mode dropout == identity
        return out


if __name__ == "__main__":
    key = jax.random.PRNGKey(0)
    k_x, k_e, k_w = jax.random.split(key, 3)

    num_nodes = 16
    dim_in = 32
    dim_out = 32
    num_edges = 40

    x = jax.random.normal(k_x, (num_nodes, dim_in), jnp.float32)
    edge_index = jax.random.randint(k_e, (2, num_edges), 0, num_nodes, jnp.int32)

    layer = BaseConvLayerPallas(dim_in, dim_out, dropout=0.1, key=k_w)
    out = layer(x, edge_index)
    out = jax.block_until_ready(out)

    # Pure-JAX f32 reference (tolerance accounts for bf16 MXU inputs).
    a_hat = build_normalized_adjacency(edge_index, num_nodes)
    ref = jnp.maximum(a_hat @ (x @ layer.weight) + layer.bias, 0.0)

    assert out.shape == (num_nodes, dim_out)
    assert bool(jnp.all(out >= 0.0)) and bool(jnp.all(jnp.isfinite(out)))
    assert bool(jnp.allclose(out, ref, atol=5e-2, rtol=5e-2)), (
        f"max abs err = {float(jnp.max(jnp.abs(out - ref)))}")
    print("KERNEL_OK")
</pallas_src>

<mosaic_0001>
module attributes {stable_mosaic.version = 11 : i64} {
  func.func @_xw_kernel(%arg0: i32, %arg1: i32, %arg2: i32, %arg3: memref<128x128xbf16, #tpu.memory_space<vmem>>, %arg4: memref<128x128xbf16, #tpu.memory_space<vmem>>, %arg5: memref<128x128xbf16, #tpu.memory_space<vmem>>, %arg6: memref<128x128xf32, #tpu.memory_space<vmem>>) attributes {dimension_semantics = [#tpu.dimension_semantics<parallel>, #tpu.dimension_semantics<parallel>, #tpu.dimension_semantics<arbitrary>], iteration_bounds = array<i64: 1, 1, 1>, scalar_prefetch = 0 : i64, scratch_operands = 1 : i64, tpu.core_type = #tpu.core_type<tc>, window_params = [{transform_indices = @transform_0, window_bounds = array<i64: 128, 128>}, {transform_indices = @transform_1, window_bounds = array<i64: 128, 128>}, {transform_indices = @transform_2, window_bounds = array<i64: 128, 128>}]} {
    %c0_i32 = arith.constant 0 : i32
    %0 = arith.cmpi eq, %arg2, %c0_i32 : i32
    %1 = arith.extui %0 : i1 to i32
    %c0_i32_0 = arith.constant 0 : i32
    %2 = arith.cmpi ne, %1, %c0_i32_0 : i32
    scf.if %2 {
      %cst_10 = arith.constant 0.000000e+00 : f32
      %12 = vector.broadcast %cst_10 : f32 to vector<128x128xf32>
      %c0_11 = arith.constant 0 : index
      %c0_12 = arith.constant 0 : index
      %13 = vector.load %arg6[%c0_11, %c0_12] : memref<128x128xf32, #tpu.memory_space<vmem>>, vector<128x128xf32>
      tpu.vector_store %arg6[%c0_11, %c0_12], %12 {strides = array<i32>} : memref<128x128xf32, #tpu.memory_space<vmem>>, vector<128x128xf32>,
    } else {
    }
    %c0 = arith.constant 0 : index
    %c0_1 = arith.constant 0 : index
    %3 = vector.load %arg6[%c0, %c0_1] : memref<128x128xf32, #tpu.memory_space<vmem>>, vector<128x128xf32>
    %c0_2 = arith.constant 0 : index
    %c0_3 = arith.constant 0 : index
    %4 = vector.load %arg3[%c0_2, %c0_3] : memref<128x128xbf16, #tpu.memory_space<vmem>>, vector<128x128xbf16>
    %c0_4 = arith.constant 0 : index
    %c0_5 = arith.constant 0 : index
    %5 = vector.load %arg4[%c0_4, %c0_5] : memref<128x128xbf16, #tpu.memory_space<vmem>>, vector<128x128xbf16>
    %cst = arith.constant dense<0.000000e+00> : vector<128x128xf32>
    %6 = tpu.matmul %4, %5, %cst {dimension_numbers = #tpu.dot_dimension_numbers<[1], [0], [0], [1], [0, 0, 1, 1], [], []>} : vector<128x128xbf16>, vector<128x128xbf16>, vector<128x128xf32> -> vector<128x128xf32>
    %7 = arith.addf %3, %6 : vector<128x128xf32>
    %c0_6 = arith.constant 0 : index
    %c0_7 = arith.constant 0 : index
    %8 = vector.load %arg6[%c0_6, %c0_7] : memref<128x128xf32, #tpu.memory_space<vmem>>, vector<128x128xf32>
    tpu.vector_store %arg6[%c0_6, %c0_7], %7 {strides = array<i32>} : memref<128x128xf32, #tpu.memory_space<vmem>>, vector<128x128xf32>,
    %c0_i32_8 = arith.constant 0 : i32
    %9 = arith.cmpi eq, %arg2, %c0_i32_8 : i32
    %10 = arith.extui %9 : i1 to i32
    %c0_i32_9 = arith.constant 0 : i32
    %11 = arith.cmpi ne, %10, %c0_i32_9 : i32
    scf.if %11 {
      %c0_10 = arith.constant 0 : index
      %c0_11 = arith.constant 0 : index
      %12 = vector.load %arg6[%c0_10, %c0_11] : memref<128x128xf32, #tpu.memory_space<vmem>>, vector<128x128xf32>
      %13 = arith.truncf %12 : vector<128x128xf32> to vector<128x128xbf16>
      %c0_12 = arith.constant 0 : index
      %c0_13 = arith.constant 0 : index
      %14 = vector.load %arg5[%c0_12, %c0_13] : memref<128x128xbf16, #tpu.memory_space<vmem>>, vector<128x128xbf16>
      tpu.vector_store %arg5[%c0_12, %c0_13], %13 {strides = array<i32>} : memref<128x128xbf16, #tpu.memory_space<vmem>>, vector<128x128xbf16>,
    } else {
    }
    return
  }
  func.func @transform_0(%arg0: i32, %arg1: i32, %arg2: i32) -> (i32, i32) {
    %c0_i32 = arith.constant 0 : i32
    return %arg0, %arg2 : i32, i32
  }
  func.func @transform_1(%arg0: i32, %arg1: i32, %arg2: i32) -> (i32, i32) {
    %c0_i32 = arith.constant 0 : i32
    return %arg2, %arg1 : i32, i32
  }
  func.func @transform_2(%arg0: i32, %arg1: i32, %arg2: i32) -> (i32, i32) {
    %c0_i32 = arith.constant 0 : i32
    return %arg0, %arg1 : i32, i32
  }
}

</mosaic_0001>

<bundles_post_ra>
// kernel: tpu_custom_call.1
= control target key start
LH: loop header
LB: loop body
LE: loop exit
PB: predicated region body
PF: predicated region fallthrough
CT: control target
= control target key end

     0   :  { %7 = vsyncpa [#allocation4], 0  ;;  %s735_s0 = inlined_call_operand.hbm [shape: bf16[128,128], index: 0, kind: input, shape index: {}]   ;;  %s736_s1 = inlined_call_operand.hbm [shape: bf16[128,128], index: 1, kind: input, shape index: {}]   ;;  %s737_s2 = inlined_call_operand.hbm [shape: bf16[128,128], index: 2, kind: output, shape index: {}]  }
   0x1   :  { %8 = vsyncpa [#allocation7], 0 }
   0x2   :  { %9 = vsyncpa [#allocation5], 0  ;;  %s697_s9 = smov [#allocation3]  }
   0x3   :  { %s15_s10 = sshll.u32 %s697_s9, 4  ;;  %s16_s10 = int_to_ptr.vmem [resolvable:$true] %s15_s10 }
   0x4   :  { %s639_s11 = scalar_lea.vmem %s16_s10, 1024  ;;  %p644_p1 = scmp.lt.s32.totalorder %s16_s10, %s16_s10 }
   0x5   :  { %p640_p0 = scmp.ne.s32.totalorder %s16_s10, %s639_s11  ;;  %p645_p2 = scmp.lt.s32.totalorder %s639_s11, %s639_s11 }
   0x7   :  { %p646_p3 = por %p645_p2, %p644_p1 }
   0x9   :  { %p647_p4 = pnand %p646_p3, %p640_p0 }
   0xb   :  { %650 = shalt.err (!%p647_p4)
}
   0xc   :  { %s698_s12 = smov 64   ;;  %s699_s13 = smov 4  }
   0xd   :  { %21 = dma.hbm_to_vmem [thread:$0]  %s735_s0, 1024, %s16_s10, [#allocation4], %s698_s12, %s698_s12, %s699_s13  }
   0xe   :  { %s700_s16 = smov [#allocation6]  }
   0xf   :  { %s27_s17 = sshll.u32 %s700_s16, 4  ;;  %s28_s17 = int_to_ptr.vmem [resolvable:$true] %s27_s17 }
  0x10   :  { %s659_s18 = scalar_lea.vmem %s28_s17, 1024  ;;  %p664_p6 = scmp.lt.s32.totalorder %s28_s17, %s28_s17 }
  0x11   :  { %p660_p5 = scmp.ne.s32.totalorder %s28_s17, %s659_s18  ;;  %p665_p7 = scmp.lt.s32.totalorder %s659_s18, %s659_s18 }
  0x13   :  { %p666_p8 = por %p665_p7, %p664_p6 }
  0x15   :  { %p667_p9 = pnand %p666_p8, %p660_p5 }
  0x17   :  { %670 = shalt.err (!%p667_p9)
}
  0x18   :  { %33 = dma.hbm_to_vmem [thread:$0]  %s736_s1, 1024, %s28_s17, [#allocation7], %s698_s12, %s698_s12, %s699_s13  }
  0x19   :  { %691 = dma.done.wait [#allocation4], 1024  }
  0x1a   :  { %692 = vsyncadd [#allocation4], 4294966272 }
  0x1b   :  { %693 = dma.done.wait [#allocation7], 1024  }
  0x1c   :  { %694 = vsyncadd [#allocation7], 4294966272  ;;  %v615_v0 = vld [vmem:[#allocation6 + $0x38] sm:$0xff]   ;;  %v616_v1 = vld [vmem:[#allocation6 + $0x30] sm:$0xff]   ;;  %s701_s0 = smov [#allocation8]  }
  0x1d   :  { %562 = vmatprep.subr.bf16.mxu0 %v615_v0  ;;  %594 = vmatprep.subr.bf16.mxu1 %v615_v0  ;;  %v617_v2 = vld [vmem:[#allocation6 + $0x28] sm:$0xff]   ;;  %v618_v3 = vld [vmem:[#allocation6 + $0x20] sm:$0xff]   ;;  %v619_v6 = vld [vmem:[#allocation6 + $0x18] sm:$0xff]   ;;  %s438_s1 = sshll.u32 %s701_s0, 4  ;;  %s439_s1 = int_to_ptr.vmem [resolvable:$true] %s438_s1 }
  0x1e   :  { %563 = vmatpush3.bf16.msra.mxu0 %v615_v0  ;;  %602 = vmatpush3.bf16.msra.mxu1 %v615_v0  ;;  %v623_v4 = vld [vmem:[#allocation3] sm:$0xff]   ;;  %v620_v7 = vld [vmem:[#allocation6 + $0x10] sm:$0xff]   ;;  %v621_v8 = vld [vmem:[#allocation6 + $0x8] sm:$0xff]   ;;  %s671_s21 = scalar_lea.vmem %s439_s1, 1024  ;;  %p676_p11 = scmp.lt.s32.totalorder %s439_s1, %s439_s1 }
  0x1f   :  { %564 = vmatprep.subr.bf16.mxu0 %v616_v1  ;;  %595 = vmatprep.subr.bf16.mxu1 %v616_v1  ;;  %v624_v5 = vld [vmem:[#allocation3 + $0x20] sm:$0xff]   ;;  %v625_v10 = vld [vmem:[#allocation3 + $0x8] sm:$0xff]   ;;  %v627_v12 = vld [vmem:[#allocation3 + $0x10] sm:$0xff]   ;;  %p672_p10 = scmp.ne.s32.totalorder %s439_s1, %s671_s21  ;;  %p677_p12 = scmp.lt.s32.totalorder %s671_s21, %s671_s21 }
  0x20   :  { %578 = vmatprep.mubr.bf16.mxu0 %v623_v4  ;;  %586 = vmatprep.mubr.bf16.mxu1 %v624_v5  ;;  %v622_v9 = vld [vmem:[#allocation6] sm:$0xff]   ;;  %v626_v11 = vld [vmem:[#allocation3 + $0x28] sm:$0xff]   ;;  %v628_v13 = vld [vmem:[#allocation3 + $0x30] sm:$0xff]  }
  0x21   :  { %v629_v14 = vld [vmem:[#allocation3 + $0x18] sm:$0xff]   ;;  %p678_p13 = por %p677_p12, %p676_p11 }
  0x22   :  { %565 = vmatpush3.bf16.msra.mxu0 %v616_v1  ;;  %603 = vmatpush3.bf16.msra.mxu1 %v616_v1  ;;  %v630_v15 = vld [vmem:[#allocation3 + $0x38] sm:$0xff]  }
  0x23   :  { %566 = vmatprep.subr.bf16.mxu0 %v617_v2  ;;  %596 = vmatprep.subr.bf16.mxu1 %v617_v2  ;;  %p679_p0 = pnand %p678_p13, %p672_p10 }
  0x26   :  { %567 = vmatpush3.bf16.msra.mxu0 %v617_v2  ;;  %604 = vmatpush3.bf16.msra.mxu1 %v617_v2 }
  0x27   :  { %568 = vmatprep.subr.bf16.mxu0 %v618_v3  ;;  %597 = vmatprep.subr.bf16.mxu1 %v618_v3 }
  0x2a   :  { %569 = vmatpush3.bf16.msra.mxu0 %v618_v3  ;;  %605 = vmatpush3.bf16.msra.mxu1 %v618_v3 }
  0x2b   :  { %570 = vmatprep.subr.bf16.mxu0 %v619_v6  ;;  %598 = vmatprep.subr.bf16.mxu1 %v619_v6 }
  0x2e   :  { %571 = vmatpush3.bf16.msra.mxu0 %v619_v6  ;;  %606 = vmatpush3.bf16.msra.mxu1 %v619_v6 }
  0x2f   :  { %572 = vmatprep.subr.bf16.mxu0 %v620_v7  ;;  %599 = vmatprep.subr.bf16.mxu1 %v620_v7 }
  0x32   :  { %573 = vmatpush3.bf16.msra.mxu0 %v620_v7  ;;  %607 = vmatpush3.bf16.msra.mxu1 %v620_v7 }
  0x33   :  { %574 = vmatprep.subr.bf16.mxu0 %v621_v8  ;;  %600 = vmatprep.subr.bf16.mxu1 %v621_v8 }
  0x36   :  { %575 = vmatpush3.bf16.msra.mxu0 %v621_v8  ;;  %608 = vmatpush3.bf16.msra.mxu1 %v621_v8 }
  0x37   :  { %576 = vmatprep.subr.bf16.mxu0 %v622_v9  ;;  %601 = vmatprep.subr.bf16.mxu1 %v622_v9 }
  0x3a   :  { %577 = vmatpush3.bf16.msra.mxu0 %v622_v9  ;;  %609 = vmatpush3.bf16.msra.mxu1 %v622_v9 }
  0x3d   :  { %579 = vmatmul.mubr.bf16.vlgmr.msra.gmra.mxu0 %v625_v10  ;;  %587 = vmatmul.mubr.bf16.vlgmr.msra.gmra.mxu1 %v626_v11 }
  0x3e   :  { %582 = vmatprep.mubr.bf16.mxu0 %v627_v12  ;;  %590 = vmatprep.mubr.bf16.mxu1 %v628_v13 }
  0x45   :  { %583 = vmatmul.mubr.bf16.gmra.mxu0 %v629_v14  ;;  %591 = vmatmul.mubr.bf16.gmra.mxu1 %v630_v15 }
  0xfd   :  { %v580_v16 = vpop.f32.mrf.mxu0  ;;  %v588_v17 = vpop.f32.mrf.mxu1 }
  0xff   :  { %v239_v18 = vpop.f32.mrf.mxu0  ;;  %v271_v19 = vpop.f32.mrf.mxu1 }
 0x101   :  { %v581_v20 = vpop.f32.mrf.mxu0  ;;  %v589_v21 = vpop.f32.mrf.mxu1 }
 0x102   :  { %v507_v22 = vpack.c.bf16 %v581_v20, %v580_v16  ;;  %v527_v23 = vpack.c.bf16 %v589_v21, %v588_v17 }
 0x103   :  { %v242_v24 = vpop.f32.mrf.mxu0  ;;  %v274_v25 = vpop.f32.mrf.mxu1 }
 0x104   :  { %539 = vst [vmem:[#allocation8 + $0x8] sm:$0xff] %v507_v22   ;;  %543 = vst [vmem:[#allocation8 + $0x28] sm:$0xff] %v527_v23   ;;  %v502_v26 = vpack.c.bf16 %v242_v24, %v239_v18  ;;  %v522_v27 = vpack.c.bf16 %v274_v25, %v271_v19 }
 0x105   :  { %v584_v28 = vpop.f32.mrf.mxu0  ;;  %v592_v29 = vpop.f32.mrf.mxu1 }
 0x106   :  { %503 = vst [vmem:[#allocation8] sm:$0xff] %v502_v26   ;;  %542 = vst [vmem:[#allocation8 + $0x20] sm:$0xff] %v522_v27  }
 0x107   :  { %v255_v30 = vpop.f32.mrf.mxu0  ;;  %v287_v31 = vpop.f32.mrf.mxu1 }
 0x109   :  { %v585_v32 = vpop.f32.mrf.mxu0  ;;  %v593_v33 = vpop.f32.mrf.mxu1 }
 0x10a   :  { %v517_v34 = vpack.c.bf16 %v585_v32, %v584_v28  ;;  %v537_v35 = vpack.c.bf16 %v593_v33, %v592_v29 }
 0x10b   :  { %v258_v36 = vpop.f32.mrf.mxu0  ;;  %v290_v37 = vpop.f32.mrf.mxu1 }
 0x10c   :  { %541 = vst [vmem:[#allocation8 + $0x18] sm:$0xff] %v517_v34   ;;  %545 = vst [vmem:[#allocation8 + $0x38] sm:$0xff] %v537_v35   ;;  %v512_v38 = vpack.c.bf16 %v258_v36, %v255_v30  ;;  %v532_v39 = vpack.c.bf16 %v290_v37, %v287_v31 }
 0x10e   :  { %540 = vst [vmem:[#allocation8 + $0x10] sm:$0xff] %v512_v38   ;;  %544 = vst [vmem:[#allocation8 + $0x30] sm:$0xff] %v532_v39  }
 0x10f   :  { %682 = shalt.err (!%p679_p0)
}
 0x110   :  { %444 = dma.vmem_to_hbm [thread:$0]  %s439_s1, 1024, %s737_s2, [#allocation5], %s698_s12, %s698_s12, %s699_s13  }
 0x111   :  { %695 = dma.done.wait [#allocation5], 1024  }
 0x112   :  { %696 = vsyncadd [#allocation5], 4294966272 }
 0x113   :  { %448 = vsyncpa [#allocation4], 1 }
 0x114   :  { %449 = vsyncpa [#allocation7], 1 }
 0x115   :  { %450 = vsyncpa [#allocation5], 1 }

</bundles_post_ra>
